<compile_context>
chip_gen: v6e
topology: v6e:2x2x1
jax: 0.10.0
libtpu: 0.0.40
codegen_flags: <defaults>
</compile_context>

<pallas_src>
import functools

import jax
import jax.numpy as jnp
from jax.experimental import pallas as pl
from jax.experimental.pallas import tpu as pltpu


# ---------------------------------------------------------------------------
# Fused kernel: encoder matmul + softplus + reparameterized sampling +
#               batched decoder matmul + mean-over-samples (via linearity).
# Grid: one axis over batch tiles (parallel).
# ---------------------------------------------------------------------------
def _vib_fused_kernel(
    x_ref, we_ref, be_ref, eps_ref, wd_ref, bd_ref,
    mu_ref, sigma_ref, z_ref, dec_ref, out_ref,
):
    dim_z = mu_ref.shape[-1]

    # ---- encoder: bf16 operands on the MXU, f32 accumulate ----
    enc = (
        jnp.dot(
            x_ref[...].astype(jnp.bfloat16),
            we_ref[...],                      # already bf16 (cast in wrapper)
            preferred_element_type=jnp.float32,
        )
        + be_ref[...]
    )
    mu = enc[:, :dim_z]
    pre = enc[:, dim_z:]
    # torch.nn.functional.softplus (threshold=20), computed once per element.
    sigma = jnp.where(pre > 20.0, pre, jnp.log1p(jnp.exp(jnp.minimum(pre, 20.0))))
    mu_ref[...] = mu
    sigma_ref[...] = sigma

    # ---- reparameterized samples, all S at once: (S, block_b, dim_z) ----
    eps = eps_ref[...]
    z = mu[None, :, :] + sigma[None, :, :] * eps
    z_ref[...] = z

    # ---- decoder: fold samples into the MXU M dimension -> ONE matmul ----
    S, bb, _ = z.shape
    z2 = z.reshape(S * bb, dim_z).astype(jnp.bfloat16)
    wd = wd_ref[...]                          # bf16, lane-padded (cast/padded in wrapper)
    bd = bd_ref[...]
    dec2 = jnp.dot(z2, wd, preferred_element_type=jnp.float32) + bd
    dec_ref[...] = dec2.reshape(S, bb, -1)

    # ---- mean over samples via decoder linearity:
    #      mean_s(z @ Wd + bd) = (mu + sigma * mean_s eps) @ Wd + bd ----
    z_mean = (mu + sigma * jnp.mean(eps, axis=0)).astype(jnp.bfloat16)
    out_ref[...] = jnp.dot(z_mean, wd, preferred_element_type=jnp.float32) + bd


# ---------------------------------------------------------------------------
# Python wrapper (glue)
# ---------------------------------------------------------------------------
@functools.partial(jax.jit, static_argnames=("dim_z", "num_samples", "training"))
def vib_forward(x, we, be, wd, bd, eps, *, dim_z, num_samples, training=True):
    B, D_in = x.shape
    D_out = wd.shape[1]
    S = num_samples

    # Batch tiling: 128-row tiles when possible (pipelines x DMA against compute,
    # keeps per-tile VMEM bounded); otherwise use the full batch as one block.
    block_b = 128 if (B % 128 == 0) else B
    n_b = B // block_b

    # Lane-dense decoder outputs: pad D_out up to a multiple of 128 so stores are
    # full-vreg (unmasked); the wrapper slices the padding back off.
    D_pad = ((D_out + 127) // 128) * 128
    if D_pad != D_out:
        wd_p = jnp.pad(wd, ((0, 0), (0, D_pad - D_out)))
        bd_p = jnp.pad(bd, ((0, 0), (0, D_pad - D_out)))
    else:
        wd_p, bd_p = wd, bd

    # bf16 weights for the MXU (halves weight DMA); biases stay f32.
    we_bf = we.astype(jnp.bfloat16)
    wd_bf = wd_p.astype(jnp.bfloat16)

    mu, sigma, z, dec_p, out_p = pl.pallas_call(
        _vib_fused_kernel,
        out_shape=(
            jax.ShapeDtypeStruct((B, dim_z), jnp.float32),        # mu
            jax.ShapeDtypeStruct((B, dim_z), jnp.float32),        # sigma
            jax.ShapeDtypeStruct((S, B, dim_z), jnp.float32),     # z
            jax.ShapeDtypeStruct((S, B, D_pad), jnp.float32),     # dec (padded)
            jax.ShapeDtypeStruct((B, D_pad), jnp.float32),        # mean output (padded)
        ),
        grid_spec=pltpu.PrefetchScalarGridSpec(
            num_scalar_prefetch=0,
            grid=(n_b,),
            in_specs=[
                pl.BlockSpec((block_b, D_in), lambda b: (b, 0)),          # x
                pl.BlockSpec((D_in, 2 * dim_z), lambda b: (0, 0)),        # We (bf16)
                pl.BlockSpec((1, 2 * dim_z), lambda b: (0, 0)),           # be
                pl.BlockSpec((S, block_b, dim_z), lambda b: (0, b, 0)),   # eps
                pl.BlockSpec((dim_z, D_pad), lambda b: (0, 0)),           # Wd (bf16, padded)
                pl.BlockSpec((1, D_pad), lambda b: (0, 0)),               # bd (padded)
            ],
            out_specs=[
                pl.BlockSpec((block_b, dim_z), lambda b: (b, 0)),         # mu
                pl.BlockSpec((block_b, dim_z), lambda b: (b, 0)),         # sigma
                pl.BlockSpec((S, block_b, dim_z), lambda b: (0, b, 0)),   # z
                pl.BlockSpec((S, block_b, D_pad), lambda b: (0, b, 0)),   # dec
                pl.BlockSpec((block_b, D_pad), lambda b: (b, 0)),         # outputs
            ],
        ),
        compiler_params=pltpu.CompilerParams(
            dimension_semantics=("parallel",),        # batch tiles independent -> megacore
            vmem_limit_bytes=48 * 1024 * 1024,        # headroom under v7x's 64 MiB VMEM
        ),
    )(x, we_bf, be, eps, wd_bf, bd_p)

    outputs = out_p[:, :D_out] if D_pad != D_out else out_p

    if training:
        dec = dec_p[..., :D_out] if D_pad != D_out else dec_p
        # TODO(synk): the (1,2,0) permute is part of the torch module contract; a consumer
        # that accepts (S, B, D_out) directly would avoid this extra HBM pass.
        result_dict = {
            "sampled_decoded_outputs": jnp.transpose(dec, (1, 2, 0)),  # (B, D_out, S)
            "sampled_encoded_features": z,
            "p_z_given_x_mu": mu,
            "p_z_given_x_sigma": sigma,
        }
        return outputs, result_dict
    return outputs


# ---------------------------------------------------------------------------
# Pure-JAX (f32) reference for correctness sanity check
# ---------------------------------------------------------------------------
def vib_forward_ref(x, we, be, wd, bd, eps, dim_z):
    enc = x @ we + be
    mu = enc[:, :dim_z]
    pre = enc[:, dim_z:]
    sigma = jnp.where(pre > 20.0, pre, jnp.log1p(jnp.exp(jnp.minimum(pre, 20.0))))
    z = mu + sigma * eps
    dec = jnp.einsum("sbz,zo->sbo", z, wd) + bd
    return dec.mean(axis=0), mu, sigma, z, dec


if __name__ == "__main__":
    # Small, deterministic configuration.
    B, D_in, dim_z, D_out, num_samples = 8, 32, 128, 16, 4

    key = jax.random.PRNGKey(0)
    k_x, k_we, k_be, k_wd, k_bd, k_eps = jax.random.split(key, 6)

    x = jax.random.normal(k_x, (B, D_in), dtype=jnp.float32)
    we = jax.random.uniform(
        k_we, (D_in, 2 * dim_z), jnp.float32, -1.0, 1.0
    ) / jnp.sqrt(D_in)
    be = jax.random.uniform(
        k_be, (1, 2 * dim_z), jnp.float32, -1.0, 1.0
    ) / jnp.sqrt(D_in)
    wd = jax.random.uniform(
        k_wd, (dim_z, D_out), jnp.float32, -1.0, 1.0
    ) / jnp.sqrt(dim_z)
    bd = jax.random.uniform(
        k_bd, (1, D_out), jnp.float32, -1.0, 1.0
    ) / jnp.sqrt(dim_z)
    # torch.normal(zeros, ones) of shape (num_samples, B, dim_z) -> explicit eps input.
    eps = jax.random.normal(k_eps, (num_samples, B, dim_z), dtype=jnp.float32)

    outputs, rd = vib_forward(
        x, we, be, wd, bd, eps, dim_z=dim_z, num_samples=num_samples, training=True
    )
    outputs = jax.block_until_ready(outputs)

    # Correctness check against pure-JAX f32 reference.
    # Tolerances loosened vs the f32 kernel because matmul operands are bf16
    # (f32 accumulation), as recommended by the perf review.
    out_ref, mu_ref, sig_ref, z_ref, dec_ref = vib_forward_ref(
        x, we, be, wd, bd, eps, dim_z
    )
    atol = rtol = 5e-2
    assert jnp.allclose(outputs, out_ref, atol=atol, rtol=rtol)
    assert jnp.allclose(rd["p_z_given_x_mu"], mu_ref, atol=atol, rtol=rtol)
    assert jnp.allclose(rd["p_z_given_x_sigma"], sig_ref, atol=atol, rtol=rtol)
    assert jnp.allclose(rd["sampled_encoded_features"], z_ref, atol=atol, rtol=rtol)
    assert jnp.allclose(
        rd["sampled_decoded_outputs"],
        jnp.transpose(dec_ref, (1, 2, 0)),
        atol=atol,
        rtol=rtol,
    )
    print("KERNEL_OK")
</pallas_src>

<mosaic_0001>
module attributes {stable_mosaic.version = 11 : i64} {
  func.func @_vib_fused_kernel(%arg0: i32, %arg1: memref<8x32xf32, #tpu.memory_space<vmem>>, %arg2: memref<32x256xbf16, #tpu.memory_space<vmem>>, %arg3: memref<1x256xf32, #tpu.memory_space<vmem>>, %arg4: memref<4x8x128xf32, #tpu.memory_space<vmem>>, %arg5: memref<128x128xbf16, #tpu.memory_space<vmem>>, %arg6: memref<1x128xf32, #tpu.memory_space<vmem>>, %arg7: memref<8x128xf32, #tpu.memory_space<vmem>>, %arg8: memref<8x128xf32, #tpu.memory_space<vmem>>, %arg9: memref<4x8x128xf32, #tpu.memory_space<vmem>>, %arg10: memref<4x8x128xf32, #tpu.memory_space<vmem>>, %arg11: memref<8x128xf32, #tpu.memory_space<vmem>>) attributes {dimension_semantics = [#tpu.dimension_semantics<parallel>], iteration_bounds = array<i64: 1>, scalar_prefetch = 0 : i64, scratch_operands = 0 : i64, tpu.core_type = #tpu.core_type<tc>, window_params = [{transform_indices = @transform_0, window_bounds = array<i64: 8, 32>}, {pipeline_mode = #tpu.pipeline_mode<synchronous>, transform_indices = @transform_1, window_bounds = array<i64: 32, 256>}, {pipeline_mode = #tpu.pipeline_mode<synchronous>, transform_indices = @transform_2, window_bounds = array<i64: 1, 256>}, {transform_indices = @transform_3, window_bounds = array<i64: 4, 8, 128>}, {pipeline_mode = #tpu.pipeline_mode<synchronous>, transform_indices = @transform_4, window_bounds = array<i64: 128, 128>}, {pipeline_mode = #tpu.pipeline_mode<synchronous>, transform_indices = @transform_5, window_bounds = array<i64: 1, 128>}, {transform_indices = @transform_6, window_bounds = array<i64: 8, 128>}, {transform_indices = @transform_7, window_bounds = array<i64: 8, 128>}, {transform_indices = @transform_8, window_bounds = array<i64: 4, 8, 128>}, {transform_indices = @transform_9, window_bounds = array<i64: 4, 8, 128>}, {transform_indices = @transform_10, window_bounds = array<i64: 8, 128>}]} {
    %c0 = arith.constant 0 : index
    %c0_0 = arith.constant 0 : index
    %0 = vector.load %arg1[%c0, %c0_0] : memref<8x32xf32, #tpu.memory_space<vmem>>, vector<8x32xf32>
    %1 = arith.truncf %0 : vector<8x32xf32> to vector<8x32xbf16>
    %c0_1 = arith.constant 0 : index
    %c0_2 = arith.constant 0 : index
    %2 = vector.load %arg2[%c0_1, %c0_2] : memref<32x256xbf16, #tpu.memory_space<vmem>>, vector<32x256xbf16>
    %cst = arith.constant dense<0.000000e+00> : vector<8x256xf32>
    %3 = tpu.matmul %1, %2, %cst {dimension_numbers = #tpu.dot_dimension_numbers<[1], [0], [0], [1], [0, 0, 1, 1], [], []>} : vector<8x32xbf16>, vector<32x256xbf16>, vector<8x256xf32> -> vector<8x256xf32>
    %c0_3 = arith.constant 0 : index
    %c0_4 = arith.constant 0 : index
    %4 = vector.load %arg3[%c0_3, %c0_4] : memref<1x256xf32, #tpu.memory_space<vmem>>, vector<1x256xf32>
    %5 = vector.broadcast %4 : vector<1x256xf32> to vector<8x256xf32>
    %6 = arith.addf %3, %5 : vector<8x256xf32>
    %7 = vector.extract_strided_slice %6 {offsets = [0, 0], sizes = [8, 128], strides = [1, 1]} : vector<8x256xf32> to vector<8x128xf32>
    %8 = vector.extract_strided_slice %6 {offsets = [0, 128], sizes = [8, 128], strides = [1, 1]} : vector<8x256xf32> to vector<8x128xf32>
    %cst_5 = arith.constant 2.000000e+01 : f32
    %9 = vector.broadcast %cst_5 : f32 to vector<8x128xf32>
    %10 = arith.cmpf ogt, %8, %9 : vector<8x128xf32>
    %cst_6 = arith.constant 2.000000e+01 : f32
    %11 = vector.broadcast %cst_6 : f32 to vector<8x128xf32>
    %12 = arith.minimumf %8, %11 : vector<8x128xf32>
    %13 = math.exp %12 : vector<8x128xf32>
    %14 = math.log1p %13 : vector<8x128xf32>
    %15 = arith.select %10, %8, %14 : vector<8x128xi1>, vector<8x128xf32>
    %c0_7 = arith.constant 0 : index
    %c0_8 = arith.constant 0 : index
    %16 = vector.load %arg7[%c0_7, %c0_8] : memref<8x128xf32, #tpu.memory_space<vmem>>, vector<8x128xf32>
    tpu.vector_store %arg7[%c0_7, %c0_8], %7 {strides = array<i32>} : memref<8x128xf32, #tpu.memory_space<vmem>>, vector<8x128xf32>,
    %c0_9 = arith.constant 0 : index
    %c0_10 = arith.constant 0 : index
    %17 = vector.load %arg8[%c0_9, %c0_10] : memref<8x128xf32, #tpu.memory_space<vmem>>, vector<8x128xf32>
    tpu.vector_store %arg8[%c0_9, %c0_10], %15 {strides = array<i32>} : memref<8x128xf32, #tpu.memory_space<vmem>>, vector<8x128xf32>,
    %c0_11 = arith.constant 0 : index
    %c0_12 = arith.constant 0 : index
    %c0_13 = arith.constant 0 : index
    %18 = vector.load %arg4[%c0_11, %c0_12, %c0_13] : memref<4x8x128xf32, #tpu.memory_space<vmem>>, vector<4x8x128xf32>
    %19 = vector.shape_cast %7 : vector<8x128xf32> to vector<1x8x128xf32>
    %20 = vector.shape_cast %15 : vector<8x128xf32> to vector<1x8x128xf32>
    %21 = vector.broadcast %20 : vector<1x8x128xf32> to vector<4x8x128xf32>
    %22 = arith.mulf %21, %18 : vector<4x8x128xf32>
    %23 = vector.broadcast %19 : vector<1x8x128xf32> to vector<4x8x128xf32>
    %24 = arith.addf %23, %22 : vector<4x8x128xf32>
    %c0_14 = arith.constant 0 : index
    %c0_15 = arith.constant 0 : index
    %c0_16 = arith.constant 0 : index
    %25 = vector.load %arg9[%c0_14, %c0_15, %c0_16] : memref<4x8x128xf32, #tpu.memory_space<vmem>>, vector<4x8x128xf32>
    tpu.vector_store %arg9[%c0_14, %c0_15, %c0_16], %24 {strides = array<i32>} : memref<4x8x128xf32, #tpu.memory_space<vmem>>, vector<4x8x128xf32>,
    %26 = vector.shape_cast %24 : vector<4x8x128xf32> to vector<32x128xf32>
    %27 = arith.truncf %26 : vector<32x128xf32> to vector<32x128xbf16>
    %c0_17 = arith.constant 0 : index
    %c0_18 = arith.constant 0 : index
    %28 = vector.load %arg5[%c0_17, %c0_18] : memref<128x128xbf16, #tpu.memory_space<vmem>>, vector<128x128xbf16>
    %c0_19 = arith.constant 0 : index
    %c0_20 = arith.constant 0 : index
    %29 = vector.load %arg6[%c0_19, %c0_20] : memref<1x128xf32, #tpu.memory_space<vmem>>, vector<1x128xf32>
    %cst_21 = arith.constant dense<0.000000e+00> : vector<32x128xf32>
    %30 = tpu.matmul %27, %28, %cst_21 {dimension_numbers = #tpu.dot_dimension_numbers<[1], [0], [0], [1], [0, 0, 1, 1], [], []>} : vector<32x128xbf16>, vector<128x128xbf16>, vector<32x128xf32> -> vector<32x128xf32>
    %31 = vector.broadcast %29 : vector<1x128xf32> to vector<32x128xf32>
    %32 = arith.addf %30, %31 : vector<32x128xf32>
    %33 = vector.shape_cast %32 : vector<32x128xf32> to vector<4x8x128xf32>
    %c0_22 = arith.constant 0 : index
    %c0_23 = arith.constant 0 : index
    %c0_24 = arith.constant 0 : index
    %34 = vector.load %arg10[%c0_22, %c0_23, %c0_24] : memref<4x8x128xf32, #tpu.memory_space<vmem>>, vector<4x8x128xf32>
    tpu.vector_store %arg10[%c0_22, %c0_23, %c0_24], %33 {strides = array<i32>} : memref<4x8x128xf32, #tpu.memory_space<vmem>>, vector<4x8x128xf32>,
    %cst_25 = arith.constant dense<0.000000e+00> : vector<8x128xf32>
    %35 = vector.multi_reduction <add>, %18, %cst_25 [0] : vector<4x8x128xf32> to vector<8x128xf32>
    %cst_26 = arith.constant 4.000000e+00 : f32
    %36 = vector.broadcast %cst_26 : f32 to vector<8x128xf32>
    %37 = arith.divf %35, %36 : vector<8x128xf32>
    %38 = arith.mulf %15, %37 : vector<8x128xf32>
    %39 = arith.addf %7, %38 : vector<8x128xf32>
    %40 = arith.truncf %39 : vector<8x128xf32> to vector<8x128xbf16>
    %cst_27 = arith.constant dense<0.000000e+00> : vector<8x128xf32>
    %41 = tpu.matmul %40, %28, %cst_27 {dimension_numbers = #tpu.dot_dimension_numbers<[1], [0], [0], [1], [0, 0, 1, 1], [], []>} : vector<8x128xbf16>, vector<128x128xbf16>, vector<8x128xf32> -> vector<8x128xf32>
    %42 = vector.broadcast %29 : vector<1x128xf32> to vector<8x128xf32>
    %43 = arith.addf %41, %42 : vector<8x128xf32>
    %c0_28 = arith.constant 0 : index
    %c0_29 = arith.constant 0 : index
    %44 = vector.load %arg11[%c0_28, %c0_29] : memref<8x128xf32, #tpu.memory_space<vmem>>, vector<8x128xf32>
    tpu.vector_store %arg11[%c0_28, %c0_29], %43 {strides = array<i32>} : memref<8x128xf32, #tpu.memory_space<vmem>>, vector<8x128xf32>,
    return
  }
  func.func @transform_0(%arg0: i32) -> (i32, i32) {
    %c0_i32 = arith.constant 0 : i32
    %c0_i32_0 = arith.constant 0 : i32
    return %arg0, %c0_i32 : i32, i32
  }
  func.func @transform_1(%arg0: i32) -> (i32, i32) {
    %c0_i32 = arith.constant 0 : i32
    %c0_i32_0 = arith.constant 0 : i32
    %c0_i32_1 = arith.constant 0 : i32
    return %c0_i32, %c0_i32_0 : i32, i32
  }
  func.func @transform_2(%arg0: i32) -> (i32, i32) {
    %c0_i32 = arith.constant 0 : i32
    %c0_i32_0 = arith.constant 0 : i32
    %c0_i32_1 = arith.constant 0 : i32
    return %c0_i32, %c0_i32_0 : i32, i32
  }
  func.func @transform_3(%arg0: i32) -> (i32, i32, i32) {
    %c0_i32 = arith.constant 0 : i32
    %c0_i32_0 = arith.constant 0 : i32
    %c0_i32_1 = arith.constant 0 : i32
    return %c0_i32, %arg0, %c0_i32_0 : i32, i32, i32
  }
  func.func @transform_4(%arg0: i32) -> (i32, i32) {
    %c0_i32 = arith.constant 0 : i32
    %c0_i32_0 = arith.constant 0 : i32
    %c0_i32_1 = arith.constant 0 : i32
    return %c0_i32, %c0_i32_0 : i32, i32
  }
  func.func @transform_5(%arg0: i32) -> (i32, i32) {
    %c0_i32 = arith.constant 0 : i32
    %c0_i32_0 = arith.constant 0 : i32
    %c0_i32_1 = arith.constant 0 : i32
    return %c0_i32, %c0_i32_0 : i32, i32
  }
  func.func @transform_6(%arg0: i32) -> (i32, i32) {
    %c0_i32 = arith.constant 0 : i32
    %c0_i32_0 = arith.constant 0 : i32
    return %arg0, %c0_i32 : i32, i32
  }
  func.func @transform_7(%arg0: i32) -> (i32, i32) {
    %c0_i32 = arith.constant 0 : i32
    %c0_i32_0 = arith.constant 0 : i32
    return %arg0, %c0_i32 : i32, i32
  }
  func.func @transform_8(%arg0: i32) -> (i32, i32, i32) {
    %c0_i32 = arith.constant 0 : i32
    %c0_i32_0 = arith.constant 0 : i32
    %c0_i32_1 = arith.constant 0 : i32
    return %c0_i32, %arg0, %c0_i32_0 : i32, i32, i32
  }
  func.func @transform_9(%arg0: i32) -> (i32, i32, i32) {
    %c0_i32 = arith.constant 0 : i32
    %c0_i32_0 = arith.constant 0 : i32
    %c0_i32_1 = arith.constant 0 : i32
    return %c0_i32, %arg0, %c0_i32_0 : i32, i32, i32
  }
  func.func @transform_10(%arg0: i32) -> (i32, i32) {
    %c0_i32 = arith.constant 0 : i32
    %c0_i32_0 = arith.constant 0 : i32
    return %arg0, %c0_i32 : i32, i32
  }
}

</mosaic_0001>

<bundles_post_ra>
// kernel: vib_forward.1
= control target key start
LH: loop header
LB: loop body
LE: loop exit
PB: predicated region body
PF: predicated region fallthrough
CT: control target
= control target key end

     0   :  { %16 = vsyncpa [#allocation3], 0  ;;  %s714_s0 = inlined_call_operand.vmem [shape: f32[8,32], index: 0, kind: input, shape index: {}]   ;;  %s715_s1 = inlined_call_operand.vmem [shape: bf16[32,256], index: 1, kind: input, shape index: {}]   ;;  %s716_s2 = inlined_call_operand.vmem [shape: f32[1,256], index: 2, kind: input, shape index: {}]   ;;  %s717_s3 = inlined_call_operand.vmem [shape: f32[4,8,128], index: 3, kind: input, shape index: {}]   ;;  %s718_s4 = inlined_call_operand.vmem [shape: bf16[128,128], index: 4, kind: input, shape index: {}]   ;;  %s719_s5 = inlined_call_operand.vmem [shape: f32[1,128], index: 5, kind: input, shape index: {}]   ;;  %s720_s6 = inlined_call_operand.hbm [shape: f32[8,128], index: 6, kind: output, shape index: {0}]   ;;  %s721_s7 = inlined_call_operand.hbm [shape: f32[8,128], index: 7, kind: output, shape index: {1}]   ;;  %s722_s8 = inlined_call_operand.hbm [shape: f32[4,8,128], index: 8, kind: output, shape index: {2}]   ;;  %s723_s9 = inlined_call_operand.vmem [shape: f32[4,8,128], index: 9, kind: output, shape index: {3}]   ;;  %s724_s10 = inlined_call_operand.hbm [shape: f32[8,128], index: 10, kind: output, shape index: {4}]  }
   0x1   :  { %17 = vsyncpa [#allocation5], 0  ;;  %v465_v0 = vld [vmem:[%s715_s1 + $0x14] ss:$8 sps:$4 sm:$0xff]   ;;  %v467_v1 = vld [vmem:[%s715_s1 + $0x10] ss:$8 sps:$4 sm:$0xff]  }
   0x2   :  { %v569_v2 = vmov 0   ;;  %86 = vmatprep.subr.bf16.mxu0 %v465_v0  ;;  %v468_v3 = vld [vmem:[%s715_s1 + $0x4] ss:$8 sps:$4 sm:$0xff]   ;;  %v470_v4 = vld [vmem:[%s715_s1] ss:$8 sps:$4 sm:$0xff]   ;;  %vm70_vm0 = vcmask 261120  }
   0x3   :  { %106 = vmatprep.mubr.bf16.mxu0 %v569_v2  ;;  %87 = vmatpush1.bf16.msra.mxu0 %v467_v1  ;;  %v32_v5 = vld [vmem:[%s714_s0] sm:$0xff] }
   0x4   :  { %88 = vmatprep.subr.bf16.mxu0 %v468_v3  ;;  %v33_v6 = vpack.c.bf16 %v32_v5, %v32_v5 }
   0x7   :  { %89 = vmatpush1.bf16.msra.mxu0 %v470_v4 }
   0x8   :  { %18 = vsyncpa [#allocation8], 0  ;;  %v471_v7 = vld [vmem:[%s718_s4 + $0x38] sm:$0xff]   ;;  %v570_v8 = vmov 0.0   ;;  %v472_v9 = vld [vmem:[%s718_s4 + $0x30] sm:$0xff]   ;;  %vm571_vm1 = vmmov 0   ;;  %v40_v16 = vlaneseq }
   0x9   :  { %436 = vmatprep.subr.bf16.mxu0 %v570_v8  ;;  %416 = vmatprep.subr.bf16.mxu1 %v471_v7  ;;  %v473_v10 = vld [vmem:[%s718_s4 + $0x28] sm:$0xff]   ;;  %v474_v11 = vld [vmem:[%s718_s4 + $0x20] sm:$0xff]   ;;  %v475_v12 = vld [vmem:[%s718_s4 + $0x18] sm:$0xff]   ;;  %s573_s25 = smov [#allocation2]  }
   0xa   :  { %387 = vmatmul.mubr.msk.bf16.vlgmr.msra.gmra.mxu0 %vm70_vm0, %v33_v6  ;;  %417 = vmatpush3.bf16.msra.mxu1 %v471_v7  ;;  %v476_v13 = vld [vmem:[%s718_s4 + $0x10] sm:$0xff]   ;;  %v477_v14 = vld [vmem:[%s718_s4 + $0x8] sm:$0xff]   ;;  %v478_v15 = vld [vmem:[%s718_s4] sm:$0xff]   ;;  %v41_v17 = vshrl.u32 %v40_v16, 7  ;;  %s328_s0 = sshll.u32 %s573_s25, 4  ;;  %s329_s0 = int_to_ptr.vmem [resolvable:$true] %s328_s0 }
   0xb   :  { %437 = vmatpush3.bf16.msra.mxu0 %v471_v7  ;;  %418 = vmatprep.subr.bf16.mxu1 %v472_v9  ;;  %v38_v19 = vld [vmem:[%s716_s2] sm:$0x3]  ;;  %v132_v34 = vld [vmem:[%s717_s3 + $0x8] sm:$0xff]  ;;  %v133_v36 = vld [vmem:[%s717_s3 + $0x10] sm:$0xff] }
   0xc   :  { %438 = vmatprep.subr.bf16.mxu0 %v570_v8  ;;  %452 = vmatprep.mubr.msk.bf16.mxu0 %vm571_vm1, %v570_v8  ;;  %v42_v18 = vsub.s32 0, %v41_v17  ;;  %v46_v20 = vsub.s32 1, %v41_v17  ;;  %v131_v33 = vld [vmem:[%s717_s3] sm:$0xff]  ;;  %v134_v39 = vld [vmem:[%s717_s3 + $0x18] sm:$0xff]  ;;  %s572_s3 = smov [#allocation4]  }
   0xd   :  { %v273_v35 = vadd.f32 %v132_v34, %v131_v33  ;;  %s338_s1 = sshll.u32 %s572_s3, 4  ;;  %s339_s1 = int_to_ptr.vmem [resolvable:$true] %s338_s1 }
   0xe   :  { %419 = vmatpush3.bf16.msra.mxu1 %v472_v9  ;;  %v43_v21 = vrot.slane %v38_v19, %v42_v18  ;;  %v47_v22 = vrot.slane %v38_v19, %v46_v20  ;;  %s483_s26 = scalar_lea.vmem %s339_s1, 128  ;;  %p488_p1 = scmp.lt.s32.totalorder %s339_s1, %s339_s1 }
   0xf   :  { %439 = vmatpush3.bf16.msra.mxu0 %v472_v9  ;;  %420 = vmatprep.subr.bf16.mxu1 %v473_v10  ;;  %v274_v38 = vadd.f32 %v273_v35, %v133_v36  ;;  %p484_p0 = scmp.ne.s32.totalorder %s339_s1, %s483_s26  ;;  %p489_p2 = scmp.lt.s32.totalorder %s483_s26, %s483_s26 }
  0x10   :  { %440 = vmatprep.subr.bf16.mxu0 %v570_v8 }
  0x11   :  { %v275_v41 = vadd.f32 %v274_v38, %v134_v39  ;;  %p490_p3 = por %p489_p2, %p488_p1 }
  0x12   :  { %421 = vmatpush3.bf16.msra.mxu1 %v473_v10 }
  0x13   :  { %441 = vmatpush3.bf16.msra.mxu0 %v473_v10  ;;  %422 = vmatprep.subr.bf16.mxu1 %v474_v11  ;;  %v277_v46 = vmul.f32 0.25, %v275_v41  ;;  %p491_p4 = pnand %p490_p3, %p484_p0 }
  0x14   :  { %442 = vmatprep.subr.bf16.mxu0 %v570_v8 }
  0x16   :  { %423 = vmatpush3.bf16.msra.mxu1 %v474_v11 }
  0x17   :  { %443 = vmatpush3.bf16.msra.mxu0 %v474_v11  ;;  %424 = vmatprep.subr.bf16.mxu1 %v475_v12 }
  0x18   :  { %444 = vmatprep.subr.bf16.mxu0 %v570_v8 }
  0x1a   :  { %425 = vmatpush3.bf16.msra.mxu1 %v475_v12 }
  0x1b   :  { %445 = vmatpush3.bf16.msra.mxu0 %v475_v12  ;;  %426 = vmatprep.subr.bf16.mxu1 %v476_v13 }
  0x1c   :  { %446 = vmatprep.subr.bf16.mxu0 %v570_v8 }
  0x1e   :  { %427 = vmatpush3.bf16.msra.mxu1 %v476_v13 }
  0x1f   :  { %447 = vmatpush3.bf16.msra.mxu0 %v476_v13  ;;  %428 = vmatprep.subr.bf16.mxu1 %v477_v14 }
  0x20   :  { %448 = vmatprep.subr.bf16.mxu0 %v570_v8 }
  0x22   :  { %429 = vmatpush3.bf16.msra.mxu1 %v477_v14 }
  0x23   :  { %449 = vmatpush3.bf16.msra.mxu0 %v477_v14  ;;  %430 = vmatprep.subr.bf16.mxu1 %v478_v15 }
  0x24   :  { %450 = vmatprep.subr.bf16.mxu0 %v570_v8 }
  0x26   :  { %431 = vmatpush3.bf16.msra.mxu1 %v478_v15 }
  0x27   :  { %451 = vmatpush3.bf16.msra.mxu0 %v478_v15 }
  0xca   :  { %v108_v23 = vpop.f32.mrf.mxu0 }
  0xcb   :  { %v109_v24 = vadd.f32 %v108_v23, %v43_v21 }
  0xcc   :  { %v110_v25 = vpop.f32.mrf.mxu0 }
  0xcd   :  { %129 = vst [vmem:[#allocation2] sm:$0xff] %v109_v24  ;;  %v111_v26 = vadd.f32 %v110_v25, %v47_v22 }
  0xce   :  { %v112_v27 = vpop.f32.mrf.mxu0 }
  0xcf   :  { %v116_v28 = vmin.f32 %v111_v26, 20.0  ;;  %vm115_vm3 = vcmp.gt.f32.partialorder %v111_v26, 20.0 }
  0xd0   :  { %v113_v29 = vpop.f32.mrf.mxu0 }
  0xd1   :  { %v117_v30 = vmul.f32 1.442695, %v116_v28 }
  0xd3   :  { %479 = vpow2.f32 %v117_v30 }
  0xe0   :  { %v480_v31 = vpop.eup %479 }
  0xe1   :  { %v119_v32 = vadd.f32 1.0, %v480_v31  ;;  %v122_v37 = vmul.f32 -0.5, %v480_v31  ;;  %v125_v42 = vand.u32 2147483647, %v480_v31 }
  0xe3   :  { %481 = vlog2.f32 %v119_v32  ;;  %v123_v40 = vadd.f32 1.0, %v122_v37  ;;  %vm126_vm2 = vcmp.lt.f32.partialorder %v125_v42, 0.0004427343 }
  0xe5   :  { %v124_v45 = vmul.f32 %v480_v31, %v123_v40 }
  0xf0   :  { %v482_v43 = vpop.eup %481 }
  0xf1   :  { %v121_v44 = vmul.f32 0.6931472, %v482_v43 }
  0xf3   :  { %v127_v47 = vsel %vm126_vm2, %v124_v45, %v121_v44 }
  0xf4   :  { %v128_v48 = vsel %vm115_vm3, %v111_v26, %v127_v47 }
  0xf5   :  { %130 = vst [vmem:[#allocation4] sm:$0xff] %v128_v48  ;;  %v135_v49 = vmul.f32 %v131_v33, %v128_v48  ;;  %v136_v50 = vmul.f32 %v132_v34, %v128_v48  ;;  %v278_v51 = vmul.f32 %v277_v46, %v128_v48  ;;  %v137_v52 = vmul.f32 %v133_v36, %v128_v48 }
  0xf6   :  { %v138_v53 = vmul.f32 %v134_v39, %v128_v48 }
  0xf7   :  { %v139_v54 = vadd.f32 %v135_v49, %v109_v24  ;;  %v140_v55 = vadd.f32 %v136_v50, %v109_v24  ;;  %v279_v56 = vadd.f32 %v278_v51, %v109_v24  ;;  %v141_v57 = vadd.f32 %v137_v52, %v109_v24 }
  0xf8   :  { %v142_v58 = vadd.f32 %v138_v53, %v109_v24 }
  0xf9   :  { %143 = vst [vmem:[#allocation6] sm:$0xff] %v139_v54  ;;  %144 = vst [vmem:[#allocation6 + $0x8] sm:$0xff] %v140_v55  ;;  %v147_v59 = vpack.c.bf16 %v140_v55, %v139_v54  ;;  %v280_v60 = vpack.c.bf16 %v279_v56, %v279_v56 }
  0xfa   :  { %145 = vst [vmem:[#allocation6 + $0x10] sm:$0xff] %v141_v57  ;;  %146 = vst [vmem:[#allocation6 + $0x18] sm:$0xff] %v142_v58  ;;  %v148_v61 = vpack.c.bf16 %v142_v58, %v141_v57 }
  0xfb   :  { %432 = vmatprep.mubr.bf16.mxu1 %v147_v59  ;;  %453 = vmatmul.mubr.bf16.vlgmr.msra.gmra.mxu0 %v280_v60 }
  0xfc   :  { %433 = vmatmul.mubr.bf16.vlgmr.msra.gmra.mxu1 %v148_v61 }
  0xfd   :  { %494 = shalt.err (!%p491_p4)
}
  0xfe   :  { %341 = dma.vmem_to_hbm [thread:$0]  %s339_s1, 128, %s721_s7, [#allocation5]  }
  0xff   :  { %s503_s29 = scalar_lea.vmem %s329_s0, 128  ;;  %p508_p6 = scmp.lt.s32.totalorder %s329_s0, %s329_s0 }
 0x100   :  { %p504_p5 = scmp.ne.s32.totalorder %s329_s0, %s503_s29  ;;  %p509_p7 = scmp.lt.s32.totalorder %s503_s29, %s503_s29 }
 0x102   :  { %p510_p8 = por %p509_p7, %p508_p6 }
 0x104   :  { %p511_p9 = pnand %p510_p8, %p504_p5 }
 0x106   :  { %514 = shalt.err (!%p511_p9)
}
 0x107   :  { %331 = dma.vmem_to_hbm [thread:$0]  %s329_s0, 128, %s720_s6, [#allocation3]  }
 0x108   :  { %s574_s12 = smov [#allocation6]  }
 0x109   :  { %s347_s13 = sshll.u32 %s574_s12, 4  ;;  %s348_s13 = int_to_ptr.vmem [resolvable:$true] %s347_s13 }
 0x10a   :  { %s523_s14 = scalar_lea.vmem %s348_s13, 512  ;;  %p528_p11 = scmp.lt.s32.totalorder %s348_s13, %s348_s13 }
 0x10b   :  { %p524_p10 = scmp.ne.s32.totalorder %s348_s13, %s523_s14  ;;  %p529_p12 = scmp.lt.s32.totalorder %s523_s14, %s523_s14 }
 0x10d   :  { %p530_p13 = por %p529_p12, %p528_p11 }
 0x10f   :  { %p531_p0 = pnand %p530_p13, %p524_p10 }
 0x111   :  { %534 = shalt.err (!%p531_p0)
}
 0x112   :  { %s575_s7 = smov 128   ;;  %s576_s15 = smov 8   ;;  %v388_v62 = vld [vmem:[%s719_s5] ss:$0 sm:$0xff] }
 0x113   :  { %353 = dma.vmem_to_hbm [thread:$0]  %s348_s13, 512, %s722_s8, [#allocation5], %s575_s7, %s575_s7, %s576_s15  }
 0x114   :  { %s577_s6 = smov [#allocation7]  }
 0x115   :  { %s362_s19 = sshll.u32 %s577_s6, 4  ;;  %s363_s19 = int_to_ptr.vmem [resolvable:$true] %s362_s19 }
 0x116   :  { %s543_s8 = scalar_lea.vmem %s363_s19, 128  ;;  %p548_p2 = scmp.lt.s32.totalorder %s363_s19, %s363_s19 }
 0x117   :  { %p544_p1 = scmp.ne.s32.totalorder %s363_s19, %s543_s8  ;;  %p549_p3 = scmp.lt.s32.totalorder %s543_s8, %s543_s8 }
 0x119   :  { %p550_p4 = por %p549_p3, %p548_p2 }
 0x11b   :  { %p551_p5 = pnand %p550_p4, %p544_p1 }
 0x1bb   :  { %v315_v63 = vpop.f32.mrf.mxu0 }
 0x1bc   :  { %v316_v0 = vadd.f32 %v388_v62, %v315_v63  ;;  %v434_v1 = vpop.f32.mrf.mxu1 }
 0x1bd   :  { %v263_v2 = vadd.f32 %v434_v1, %v388_v62  ;;  %v454_v3 = vpop.f32.mrf.mxu0 }
 0x1be   :  { %321 = vst [vmem:[#allocation7] sm:$0xff] %v316_v0  ;;  %v254_v4 = vpop.f32.mrf.mxu1 }
 0x1bf   :  { %271 = vst [vmem:[%s723_s9 + $0x10] sm:$0xff] %v263_v2  ;;  %v255_v5 = vadd.f32 %v388_v62, %v254_v4  ;;  %v318_v6 = vpop.f32.mrf.mxu0 }
 0x1c0   :  { %554 = shalt.err (!%p551_p5)
}
 0x1c1   :  { %365 = dma.vmem_to_hbm [thread:$0]  %s363_s19, 128, %s724_s10, [#allocation8]   ;;  %v435_v7 = vpop.f32.mrf.mxu1  ;;  %269 = vst [vmem:[%s723_s9] sm:$0xff] %v255_v5  ;;  %v455_v9 = vpop.f32.mrf.mxu0 }
 0x1c2   :  { %v266_v8 = vadd.f32 %v435_v7, %v388_v62 }
 0x1c3   :  { %v257_v10 = vpop.f32.mrf.mxu1 }
 0x1c4   :  { %272 = vst [vmem:[%s723_s9 + $0x18] sm:$0xff] %v266_v8  ;;  %v258_v11 = vadd.f32 %v388_v62, %v257_v10 }
 0x1c6   :  { %270 = vst [vmem:[%s723_s9 + $0x8] sm:$0xff] %v258_v11 }
 0x1c7   :  { %563 = dma.done.wait [#allocation3], 128  }
 0x1c8   :  { %564 = vsyncadd [#allocation3], 4294967168 }
 0x1c9   :  { %565 = dma.done.wait [#allocation5], 640  }
 0x1ca   :  { %566 = vsyncadd [#allocation5], 4294966656 }
 0x1cb   :  { %567 = dma.done.wait [#allocation8], 128  }
 0x1cc   :  { %568 = vsyncadd [#allocation8], 4294967168 }
 0x1cd   :  { %380 = vsyncpa [#allocation3], 1 }
 0x1ce   :  { %381 = vsyncpa [#allocation5], 1 }
 0x1cf   :  { %382 = vsyncpa [#allocation8], 1 }

</bundles_post_ra>
